<compile_context>
chip_gen: v5e
topology: v5e:2x2
jax: 0.10.0
libtpu: 0.0.40
codegen_flags: <defaults>
</compile_context>

<pallas_src>
import functools
import math

import numpy as np
import jax
import jax.numpy as jnp
from jax import lax
from jax.experimental import pallas as pl
from jax.experimental.pallas import tpu as pltpu


def _round_up(x, m):
    return ((x + m - 1) // m) * m


# ----------------------------------------------------------------------------
# Pallas kernel: one grid step == T_BLK timesteps (sequential / "arbitrary").
# Hidden state is carried across grid steps in a float32 VMEM scratch buffer.
# Per inner step t:   h_t = tanh(xw_t + h_{t-1} @ W_hh^T)
# ----------------------------------------------------------------------------
def prnn_recurrence_kernel(xw_ref,    # (T_BLK, Np, Hp) f32  precomputed x@W_in^T + b
                           whhT_ref,  # (Hp, Hp)        bf16 W_hh^T (loop-invariant)
                           h_ref,     # (T_BLK, Np, Hp) f32  hidden states out
                           hstate,    # (Np, Hp)        f32  VMEM carry
                           *, t_blk):
    @pl.when(pl.program_id(0) == 0)
    def _():
        hstate[...] = jnp.zeros_like(hstate)   # default zero initial state

    whhT = whhT_ref[...]                       # bf16; resident for the whole block

    def step(t, h):
        # MXU: bf16 operands, f32 accumulation; add + tanh in f32 on VPU/EUP.
        pre = xw_ref[t] + jnp.dot(h.astype(jnp.bfloat16), whhT,
                                  preferred_element_type=jnp.float32)
        h_new = jnp.tanh(pre)                  # f32 activations / carry
        h_ref[t] = h_new
        return h_new

    # unroll=True: static trip count -> LLO scheduler sees the whole block.
    hstate[...] = lax.fori_loop(0, t_blk, step, hstate[...], unroll=True)


def prnn_rnn_pallas(x, W_in, W_hh, bias, W_out, outmask, *, t_blk=None):
    """x: (N, L, D) batch-major. Returns (y_t, h_t), both batch-major."""
    N, L, D = x.shape
    H = W_hh.shape[0]

    # Adaptive time block: big enough to amortize per-grid-step overhead,
    # small enough to avoid useless padded timesteps on short sequences.
    if t_blk is None:
        t_blk = 8 if L <= 64 else 16
    t_blk = max(1, min(t_blk, L))

    # --- hoisted input projection: one big MXU matmul over ALL timesteps -----
    # bf16 operands, f32 accumulation; the einsum also emits the time-major
    # (L, N, H) layout the recurrent kernel wants (no separate transpose of x).
    xw = jnp.einsum('nld,hd->lnh', x.astype(jnp.bfloat16),
                    W_in.astype(jnp.bfloat16),
                    preferred_element_type=jnp.float32)
    xw = xw + bias.astype(jnp.float32)[None, None, :]            # (L, N, H) f32

    # --- pad to full vreg tiles: batch -> 8 sublanes, hidden -> 128 lanes ----
    Np = _round_up(max(N, 8), 8)
    Hp = _round_up(max(H, 128), 128)
    Lp = _round_up(L, t_blk)
    xw = jnp.pad(xw, ((0, Lp - L), (0, Np - N), (0, Hp - H)))
    whhT = jnp.pad(W_hh.T.astype(jnp.bfloat16), ((0, Hp - H), (0, Hp - H)))

    h_tm = pl.pallas_call(
        functools.partial(prnn_recurrence_kernel, t_blk=t_blk),
        out_shape=jax.ShapeDtypeStruct((Lp, Np, Hp), jnp.float32),
        grid_spec=pltpu.PrefetchScalarGridSpec(
            num_scalar_prefetch=0,
            grid=(Lp // t_blk,),
            in_specs=[
                pl.BlockSpec((t_blk, Np, Hp), lambda i: (i, 0, 0)),  # xw block
                # Loop-invariant weight: constant index_map => DMA'd only once
                # and kept resident in VMEM across the whole recurrence.
                pl.BlockSpec((Hp, Hp), lambda i: (0, 0)),            # W_hh^T
            ],
            out_specs=pl.BlockSpec((t_blk, Np, Hp), lambda i: (i, 0, 0)),
            scratch_shapes=[pltpu.VMEM((Np, Hp), jnp.float32)],
        ),
        compiler_params=pltpu.CompilerParams(
            dimension_semantics=("arbitrary",)),   # recurrence -> sequential
    )(xw, whhT)

    h_tm = h_tm[:L, :N, :H]                                        # (L, N, H)

    # --- hoisted output projection; einsum folds the L<->N transpose for y ---
    allout = jax.nn.sigmoid(
        jnp.einsum('lnh,oh->nlo', h_tm.astype(jnp.bfloat16),
                   W_out.astype(jnp.bfloat16),
                   preferred_element_type=jnp.float32))            # (N, L, O)
    mask = jnp.asarray(np.asarray(outmask, dtype=bool))
    y_t = jnp.where(mask[None, :, None], allout, 0.0)

    h_t = jnp.transpose(h_tm, (1, 0, 2))                           # (N, L, H)
    return y_t, h_t


# ----------------------------------------------------------------------------
# Glue: restructure_inputs (host-side numpy masks, mirrors the PyTorch code).
# ----------------------------------------------------------------------------
def restructure_inputs(obs, act, *, predOffset=1, actOffset=0,
                       inMask=(True,), outMask=None, actMask=None):
    inMask = list(inMask)
    if outMask is None:
        outMask = [True for _ in inMask]
    if actMask is None:
        actMask = [True for _ in inMask]

    # actpad: ConstantPad1d((0,0,actOffset,0)) pads the time dim at the front.
    act = jnp.pad(act, ((0, 0), (actOffset, 0), (0, 0)))

    obs_target = obs[:, predOffset:, :]
    minsize = min(obs.shape[1], act.shape[1], obs_target.shape[1])
    obs = obs[:, :minsize, :]
    act = act[:, :minsize, :]
    obs_target = obs_target[:, :minsize, :]

    obsmask = np.resize(np.array(inMask), minsize)
    actmask = np.resize(np.array(actMask), minsize)
    outmask = np.resize(np.array(outMask), minsize)

    obs_out = jnp.where(jnp.asarray(obsmask)[None, :, None], obs, 0.0)
    act_out = jnp.where(jnp.asarray(actmask)[None, :, None], act, 0.0)
    obs_target_out = jnp.where(jnp.asarray(outmask)[None, :, None], obs_target, 0.0)

    # dropout p=0 -> identity
    x_t = jnp.concatenate([obs_out, act_out], axis=2)
    return x_t, obs_target_out, outmask


def prnn_forward(obs, act, params, *, predOffset=1, actOffset=0,
                 inMask=(True,), outMask=None, actMask=None):
    """Full pRNN.forward: returns (y_t, h_t, obs_target), all (N, L, *)."""
    x_t, obs_target, outmask = restructure_inputs(
        obs, act, predOffset=predOffset, actOffset=actOffset,
        inMask=inMask, outMask=outMask, actMask=actMask)
    y_t, h_t = prnn_rnn_pallas(x_t, params["W_in"], params["W_hh"],
                               params["bias"], params["W_out"], outmask)
    return y_t, h_t, obs_target


# ----------------------------------------------------------------------------
# Pure-JAX reference (same bf16-operand / f32-accumulate matmul policy).
# ----------------------------------------------------------------------------
def prnn_rnn_ref(x, W_in, W_hh, bias, W_out, outmask):
    xw = jnp.einsum('nld,hd->lnh', x.astype(jnp.bfloat16),
                    W_in.astype(jnp.bfloat16),
                    preferred_element_type=jnp.float32)
    xw = xw + bias.astype(jnp.float32)[None, None, :]
    whhT = W_hh.T.astype(jnp.bfloat16)

    def step(h, xw_t):
        h_new = jnp.tanh(xw_t + jnp.dot(h.astype(jnp.bfloat16), whhT,
                                        preferred_element_type=jnp.float32))
        return h_new, h_new

    h0 = jnp.zeros((x.shape[0], W_hh.shape[0]), jnp.float32)
    _, hs = lax.scan(step, h0, xw)
    h_t = jnp.transpose(hs, (1, 0, 2))
    allout = jax.nn.sigmoid(
        jnp.einsum('nlh,oh->nlo', h_t.astype(jnp.bfloat16),
                   W_out.astype(jnp.bfloat16),
                   preferred_element_type=jnp.float32))
    y_t = jnp.where(jnp.asarray(np.asarray(outmask, dtype=bool))[None, :, None],
                    allout, 0.0)
    return y_t, h_t


# ----------------------------------------------------------------------------
# Main
# ----------------------------------------------------------------------------
if __name__ == "__main__":
    # Small shapes consistent with the module's (N, L, H) convention.
    batch, obs_size, act_size, hidden_size = 2, 8, 4, 32
    T = 24                      # action length; obs is one timestep longer
    neuralTimescale = 2
    input_size = obs_size + act_size

    key = jax.random.PRNGKey(0)
    k_obs, k_act, k1, k2, k3, k4 = jax.random.split(key, 6)

    obs = jax.random.uniform(k_obs, (batch, T + 1, obs_size), dtype=jnp.float32)
    act = jax.random.uniform(k_act, (batch, T, act_size), dtype=jnp.float32)

    # Deterministic parameter init (torch-RNNCell-style uniform(-1/sqrt(H), 1/sqrt(H))).
    stdv = 1.0 / math.sqrt(hidden_size)
    W_in = jax.random.uniform(k1, (hidden_size, input_size),
                              minval=-stdv, maxval=stdv, dtype=jnp.float32)
    W_hh = jax.random.uniform(k2, (hidden_size, hidden_size),
                              minval=-stdv, maxval=stdv, dtype=jnp.float32)
    # __init__: W_hh += eye(H) * (1 - 1/neuralTimescale)
    W_hh = W_hh + jnp.eye(hidden_size, dtype=jnp.float32) * (1.0 - 1.0 / neuralTimescale)
    bias = jax.random.uniform(k3, (hidden_size,),
                              minval=-stdv, maxval=stdv, dtype=jnp.float32)
    W_out = jax.random.uniform(k4, (obs_size, hidden_size),
                               minval=-stdv, maxval=stdv, dtype=jnp.float32)

    params = {"W_in": W_in, "W_hh": W_hh, "bias": bias, "W_out": W_out}

    y_t, h_t, obs_target = prnn_forward(obs, act, params)
    jax.block_until_ready((y_t, h_t, obs_target))

    # Correctness check against a pure-JAX reference with the same numerics.
    x_t, obs_target_ref, outmask = restructure_inputs(obs, act)
    y_ref, h_ref = prnn_rnn_ref(x_t, W_in, W_hh, bias, W_out, outmask)
    assert y_t.shape == (batch, T, obs_size)
    assert h_t.shape == (batch, T, hidden_size)
    assert obs_target.shape == (batch, T, obs_size)
    if not (np.allclose(np.asarray(y_t), np.asarray(y_ref), atol=5e-3, rtol=5e-3) and
            np.allclose(np.asarray(h_t), np.asarray(h_ref), atol=5e-3, rtol=5e-3)):
        raise AssertionError("Pallas pRNN output mismatch vs. pure-JAX reference")

    print("KERNEL_OK")
</pallas_src>

<mosaic_0001>
module attributes {stable_mosaic.version = 11 : i64} {
  func.func @prnn_recurrence_kernel(%arg0: i32, %arg1: memref<8x8x128xf32, #tpu.memory_space<vmem>>, %arg2: memref<128x128xbf16, #tpu.memory_space<vmem>>, %arg3: memref<8x8x128xf32, #tpu.memory_space<vmem>>, %arg4: memref<8x128xf32, #tpu.memory_space<vmem>>) attributes {dimension_semantics = [#tpu.dimension_semantics<arbitrary>], iteration_bounds = array<i64: 3>, scalar_prefetch = 0 : i64, scratch_operands = 1 : i64, tpu.core_type = #tpu.core_type<tc>, window_params = [{transform_indices = @transform_0, window_bounds = array<i64: 8, 8, 128>}, {pipeline_mode = #tpu.pipeline_mode<synchronous>, transform_indices = @transform_1, window_bounds = array<i64: 128, 128>}, {transform_indices = @transform_2, window_bounds = array<i64: 8, 8, 128>}]} {
    %c0_i32 = arith.constant 0 : i32
    %0 = arith.cmpi eq, %arg0, %c0_i32 : i32
    %1 = arith.extui %0 : i1 to i32
    %c0_i32_0 = arith.constant 0 : i32
    %2 = arith.cmpi ne, %1, %c0_i32_0 : i32
    scf.if %2 {
      %cst_46 = arith.constant 0.000000e+00 : f32
      %94 = vector.broadcast %cst_46 : f32 to vector<8x128xf32>
      %c0_47 = arith.constant 0 : index
      %c0_48 = arith.constant 0 : index
      %95 = vector.load %arg4[%c0_47, %c0_48] : memref<8x128xf32, #tpu.memory_space<vmem>>, vector<8x128xf32>
      tpu.vector_store %arg4[%c0_47, %c0_48], %94 {strides = array<i32>} : memref<8x128xf32, #tpu.memory_space<vmem>>, vector<8x128xf32>,
    } else {
    }
    %c0 = arith.constant 0 : index
    %c0_1 = arith.constant 0 : index
    %3 = vector.load %arg2[%c0, %c0_1] : memref<128x128xbf16, #tpu.memory_space<vmem>>, vector<128x128xbf16>
    %c0_2 = arith.constant 0 : index
    %c0_3 = arith.constant 0 : index
    %4 = vector.load %arg4[%c0_2, %c0_3] : memref<8x128xf32, #tpu.memory_space<vmem>>, vector<8x128xf32>
    %c0_i32_4 = arith.constant 0 : i32
    %5 = arith.index_cast %c0_i32_4 : i32 to index
    %c0_5 = arith.constant 0 : index
    %c0_6 = arith.constant 0 : index
    %6 = vector.load %arg1[%5, %c0_5, %c0_6] : memref<8x8x128xf32, #tpu.memory_space<vmem>>, vector<1x8x128xf32>
    %7 = vector.shape_cast %6 : vector<1x8x128xf32> to vector<8x128xf32>
    %8 = arith.truncf %4 : vector<8x128xf32> to vector<8x128xbf16>
    %cst = arith.constant dense<0.000000e+00> : vector<8x128xf32>
    %9 = tpu.matmul %8, %3, %cst {dimension_numbers = #tpu.dot_dimension_numbers<[1], [0], [0], [1], [0, 0, 1, 1], [], []>} : vector<8x128xbf16>, vector<128x128xbf16>, vector<8x128xf32> -> vector<8x128xf32>
    %10 = arith.addf %7, %9 : vector<8x128xf32>
    %11 = math.tanh %10 : vector<8x128xf32>
    %12 = arith.index_cast %c0_i32_4 : i32 to index
    %c0_7 = arith.constant 0 : index
    %c0_8 = arith.constant 0 : index
    %13 = vector.load %arg3[%12, %c0_7, %c0_8] : memref<8x8x128xf32, #tpu.memory_space<vmem>>, vector<1x8x128xf32>
    %14 = vector.shape_cast %13 : vector<1x8x128xf32> to vector<8x128xf32>
    %15 = vector.shape_cast %11 : vector<8x128xf32> to vector<1x8x128xf32>
    tpu.vector_store %arg3[%12, %c0_7, %c0_8], %15 {strides = array<i32>} : memref<8x8x128xf32, #tpu.memory_space<vmem>>, vector<1x8x128xf32>,
    %c1_i32 = arith.constant 1 : i32
    %16 = arith.index_cast %c1_i32 : i32 to index
    %c0_9 = arith.constant 0 : index
    %c0_10 = arith.constant 0 : index
    %17 = vector.load %arg1[%16, %c0_9, %c0_10] : memref<8x8x128xf32, #tpu.memory_space<vmem>>, vector<1x8x128xf32>
    %18 = vector.shape_cast %17 : vector<1x8x128xf32> to vector<8x128xf32>
    %19 = arith.truncf %11 : vector<8x128xf32> to vector<8x128xbf16>
    %cst_11 = arith.constant dense<0.000000e+00> : vector<8x128xf32>
    %20 = tpu.matmul %19, %3, %cst_11 {dimension_numbers = #tpu.dot_dimension_numbers<[1], [0], [0], [1], [0, 0, 1, 1], [], []>} : vector<8x128xbf16>, vector<128x128xbf16>, vector<8x128xf32> -> vector<8x128xf32>
    %21 = arith.addf %18, %20 : vector<8x128xf32>
    %22 = math.tanh %21 : vector<8x128xf32>
    %23 = arith.index_cast %c1_i32 : i32 to index
    %c0_12 = arith.constant 0 : index
    %c0_13 = arith.constant 0 : index
    %24 = vector.load %arg3[%23, %c0_12, %c0_13] : memref<8x8x128xf32, #tpu.memory_space<vmem>>, vector<1x8x128xf32>
    %25 = vector.shape_cast %24 : vector<1x8x128xf32> to vector<8x128xf32>
    %26 = vector.shape_cast %22 : vector<8x128xf32> to vector<1x8x128xf32>
    tpu.vector_store %arg3[%23, %c0_12, %c0_13], %26 {strides = array<i32>} : memref<8x8x128xf32, #tpu.memory_space<vmem>>, vector<1x8x128xf32>,
    %c2_i32 = arith.constant 2 : i32
    %27 = arith.index_cast %c2_i32 : i32 to index
    %c0_14 = arith.constant 0 : index
    %c0_15 = arith.constant 0 : index
    %28 = vector.load %arg1[%27, %c0_14, %c0_15] : memref<8x8x128xf32, #tpu.memory_space<vmem>>, vector<1x8x128xf32>
    %29 = vector.shape_cast %28 : vector<1x8x128xf32> to vector<8x128xf32>
    %30 = arith.truncf %22 : vector<8x128xf32> to vector<8x128xbf16>
    %cst_16 = arith.constant dense<0.000000e+00> : vector<8x128xf32>
    %31 = tpu.matmul %30, %3, %cst_16 {dimension_numbers = #tpu.dot_dimension_numbers<[1], [0], [0], [1], [0, 0, 1, 1], [], []>} : vector<8x128xbf16>, vector<128x128xbf16>, vector<8x128xf32> -> vector<8x128xf32>
    %32 = arith.addf %29, %31 : vector<8x128xf32>
    %33 = math.tanh %32 : vector<8x128xf32>
    %34 = arith.index_cast %c2_i32 : i32 to index
    %c0_17 = arith.constant 0 : index
    %c0_18 = arith.constant 0 : index
    %35 = vector.load %arg3[%34, %c0_17, %c0_18] : memref<8x8x128xf32, #tpu.memory_space<vmem>>, vector<1x8x128xf32>
    %36 = vector.shape_cast %35 : vector<1x8x128xf32> to vector<8x128xf32>
    %37 = vector.shape_cast %33 : vector<8x128xf32> to vector<1x8x128xf32>
    tpu.vector_store %arg3[%34, %c0_17, %c0_18], %37 {strides = array<i32>} : memref<8x8x128xf32, #tpu.memory_space<vmem>>, vector<1x8x128xf32>,
    %c3_i32 = arith.constant 3 : i32
    %38 = arith.index_cast %c3_i32 : i32 to index
    %c0_19 = arith.constant 0 : index
    %c0_20 = arith.constant 0 : index
    %39 = vector.load %arg1[%38, %c0_19, %c0_20] : memref<8x8x128xf32, #tpu.memory_space<vmem>>, vector<1x8x128xf32>
    %40 = vector.shape_cast %39 : vector<1x8x128xf32> to vector<8x128xf32>
    %41 = arith.truncf %33 : vector<8x128xf32> to vector<8x128xbf16>
    %cst_21 = arith.constant dense<0.000000e+00> : vector<8x128xf32>
    %42 = tpu.matmul %41, %3, %cst_21 {dimension_numbers = #tpu.dot_dimension_numbers<[1], [0], [0], [1], [0, 0, 1, 1], [], []>} : vector<8x128xbf16>, vector<128x128xbf16>, vector<8x128xf32> -> vector<8x128xf32>
    %43 = arith.addf %40, %42 : vector<8x128xf32>
    %44 = math.tanh %43 : vector<8x128xf32>
    %45 = arith.index_cast %c3_i32 : i32 to index
    %c0_22 = arith.constant 0 : index
    %c0_23 = arith.constant 0 : index
    %46 = vector.load %arg3[%45, %c0_22, %c0_23] : memref<8x8x128xf32, #tpu.memory_space<vmem>>, vector<1x8x128xf32>
    %47 = vector.shape_cast %46 : vector<1x8x128xf32> to vector<8x128xf32>
    %48 = vector.shape_cast %44 : vector<8x128xf32> to vector<1x8x128xf32>
    tpu.vector_store %arg3[%45, %c0_22, %c0_23], %48 {strides = array<i32>} : memref<8x8x128xf32, #tpu.memory_space<vmem>>, vector<1x8x128xf32>,
    %c4_i32 = arith.constant 4 : i32
    %49 = arith.index_cast %c4_i32 : i32 to index
    %c0_24 = arith.constant 0 : index
    %c0_25 = arith.constant 0 : index
    %50 = vector.load %arg1[%49, %c0_24, %c0_25] : memref<8x8x128xf32, #tpu.memory_space<vmem>>, vector<1x8x128xf32>
    %51 = vector.shape_cast %50 : vector<1x8x128xf32> to vector<8x128xf32>
    %52 = arith.truncf %44 : vector<8x128xf32> to vector<8x128xbf16>
    %cst_26 = arith.constant dense<0.000000e+00> : vector<8x128xf32>
    %53 = tpu.matmul %52, %3, %cst_26 {dimension_numbers = #tpu.dot_dimension_numbers<[1], [0], [0], [1], [0, 0, 1, 1], [], []>} : vector<8x128xbf16>, vector<128x128xbf16>, vector<8x128xf32> -> vector<8x128xf32>
    %54 = arith.addf %51, %53 : vector<8x128xf32>
    %55 = math.tanh %54 : vector<8x128xf32>
    %56 = arith.index_cast %c4_i32 : i32 to index
    %c0_27 = arith.constant 0 : index
    %c0_28 = arith.constant 0 : index
    %57 = vector.load %arg3[%56, %c0_27, %c0_28] : memref<8x8x128xf32, #tpu.memory_space<vmem>>, vector<1x8x128xf32>
    %58 = vector.shape_cast %57 : vector<1x8x128xf32> to vector<8x128xf32>
    %59 = vector.shape_cast %55 : vector<8x128xf32> to vector<1x8x128xf32>
    tpu.vector_store %arg3[%56, %c0_27, %c0_28], %59 {strides = array<i32>} : memref<8x8x128xf32, #tpu.memory_space<vmem>>, vector<1x8x128xf32>,
    %c5_i32 = arith.constant 5 : i32
    %60 = arith.index_cast %c5_i32 : i32 to index
    %c0_29 = arith.constant 0 : index
    %c0_30 = arith.constant 0 : index
    %61 = vector.load %arg1[%60, %c0_29, %c0_30] : memref<8x8x128xf32, #tpu.memory_space<vmem>>, vector<1x8x128xf32>
    %62 = vector.shape_cast %61 : vector<1x8x128xf32> to vector<8x128xf32>
    %63 = arith.truncf %55 : vector<8x128xf32> to vector<8x128xbf16>
    %cst_31 = arith.constant dense<0.000000e+00> : vector<8x128xf32>
    %64 = tpu.matmul %63, %3, %cst_31 {dimension_numbers = #tpu.dot_dimension_numbers<[1], [0], [0], [1], [0, 0, 1, 1], [], []>} : vector<8x128xbf16>, vector<128x128xbf16>, vector<8x128xf32> -> vector<8x128xf32>
    %65 = arith.addf %62, %64 : vector<8x128xf32>
    %66 = math.tanh %65 : vector<8x128xf32>
    %67 = arith.index_cast %c5_i32 : i32 to index
    %c0_32 = arith.constant 0 : index
    %c0_33 = arith.constant 0 : index
    %68 = vector.load %arg3[%67, %c0_32, %c0_33] : memref<8x8x128xf32, #tpu.memory_space<vmem>>, vector<1x8x128xf32>
    %69 = vector.shape_cast %68 : vector<1x8x128xf32> to vector<8x128xf32>
    %70 = vector.shape_cast %66 : vector<8x128xf32> to vector<1x8x128xf32>
    tpu.vector_store %arg3[%67, %c0_32, %c0_33], %70 {strides = array<i32>} : memref<8x8x128xf32, #tpu.memory_space<vmem>>, vector<1x8x128xf32>,
    %c6_i32 = arith.constant 6 : i32
    %71 = arith.index_cast %c6_i32 : i32 to index
    %c0_34 = arith.constant 0 : index
    %c0_35 = arith.constant 0 : index
    %72 = vector.load %arg1[%71, %c0_34, %c0_35] : memref<8x8x128xf32, #tpu.memory_space<vmem>>, vector<1x8x128xf32>
    %73 = vector.shape_cast %72 : vector<1x8x128xf32> to vector<8x128xf32>
    %74 = arith.truncf %66 : vector<8x128xf32> to vector<8x128xbf16>
    %cst_36 = arith.constant dense<0.000000e+00> : vector<8x128xf32>
    %75 = tpu.matmul %74, %3, %cst_36 {dimension_numbers = #tpu.dot_dimension_numbers<[1], [0], [0], [1], [0, 0, 1, 1], [], []>} : vector<8x128xbf16>, vector<128x128xbf16>, vector<8x128xf32> -> vector<8x128xf32>
    %76 = arith.addf %73, %75 : vector<8x128xf32>
    %77 = math.tanh %76 : vector<8x128xf32>
    %78 = arith.index_cast %c6_i32 : i32 to index
    %c0_37 = arith.constant 0 : index
    %c0_38 = arith.constant 0 : index
    %79 = vector.load %arg3[%78, %c0_37, %c0_38] : memref<8x8x128xf32, #tpu.memory_space<vmem>>, vector<1x8x128xf32>
    %80 = vector.shape_cast %79 : vector<1x8x128xf32> to vector<8x128xf32>
    %81 = vector.shape_cast %77 : vector<8x128xf32> to vector<1x8x128xf32>
    tpu.vector_store %arg3[%78, %c0_37, %c0_38], %81 {strides = array<i32>} : memref<8x8x128xf32, #tpu.memory_space<vmem>>, vector<1x8x128xf32>,
    %c7_i32 = arith.constant 7 : i32
    %82 = arith.index_cast %c7_i32 : i32 to index
    %c0_39 = arith.constant 0 : index
    %c0_40 = arith.constant 0 : index
    %83 = vector.load %arg1[%82, %c0_39, %c0_40] : memref<8x8x128xf32, #tpu.memory_space<vmem>>, vector<1x8x128xf32>
    %84 = vector.shape_cast %83 : vector<1x8x128xf32> to vector<8x128xf32>
    %85 = arith.truncf %77 : vector<8x128xf32> to vector<8x128xbf16>
    %cst_41 = arith.constant dense<0.000000e+00> : vector<8x128xf32>
    %86 = tpu.matmul %85, %3, %cst_41 {dimension_numbers = #tpu.dot_dimension_numbers<[1], [0], [0], [1], [0, 0, 1, 1], [], []>} : vector<8x128xbf16>, vector<128x128xbf16>, vector<8x128xf32> -> vector<8x128xf32>
    %87 = arith.addf %84, %86 : vector<8x128xf32>
    %88 = math.tanh %87 : vector<8x128xf32>
    %89 = arith.index_cast %c7_i32 : i32 to index
    %c0_42 = arith.constant 0 : index
    %c0_43 = arith.constant 0 : index
    %90 = vector.load %arg3[%89, %c0_42, %c0_43] : memref<8x8x128xf32, #tpu.memory_space<vmem>>, vector<1x8x128xf32>
    %91 = vector.shape_cast %90 : vector<1x8x128xf32> to vector<8x128xf32>
    %92 = vector.shape_cast %88 : vector<8x128xf32> to vector<1x8x128xf32>
    tpu.vector_store %arg3[%89, %c0_42, %c0_43], %92 {strides = array<i32>} : memref<8x8x128xf32, #tpu.memory_space<vmem>>, vector<1x8x128xf32>,
    %c8_i32 = arith.constant 8 : i32
    %c0_44 = arith.constant 0 : index
    %c0_45 = arith.constant 0 : index
    %93 = vector.load %arg4[%c0_44, %c0_45] : memref<8x128xf32, #tpu.memory_space<vmem>>, vector<8x128xf32>
    tpu.vector_store %arg4[%c0_44, %c0_45], %88 {strides = array<i32>} : memref<8x128xf32, #tpu.memory_space<vmem>>, vector<8x128xf32>,
    return
  }
  func.func @transform_0(%arg0: i32) -> (i32, i32, i32) {
    %c0_i32 = arith.constant 0 : i32
    %c0_i32_0 = arith.constant 0 : i32
    %c0_i32_1 = arith.constant 0 : i32
    return %arg0, %c0_i32, %c0_i32_0 : i32, i32, i32
  }
  func.func @transform_1(%arg0: i32) -> (i32, i32) {
    %c0_i32 = arith.constant 0 : i32
    %c0_i32_0 = arith.constant 0 : i32
    %c0_i32_1 = arith.constant 0 : i32
    return %c0_i32, %c0_i32_0 : i32, i32
  }
  func.func @transform_2(%arg0: i32) -> (i32, i32, i32) {
    %c0_i32 = arith.constant 0 : i32
    %c0_i32_0 = arith.constant 0 : i32
    %c0_i32_1 = arith.constant 0 : i32
    return %arg0, %c0_i32, %c0_i32_0 : i32, i32, i32
  }
}

</mosaic_0001>

<bundles_post_ra>
// kernel: tpu_custom_call.1
= control target key start
LH: loop header
LB: loop body
LE: loop exit
PB: predicated region body
PF: predicated region fallthrough
CT: control target
= control target key end

     0   :  { %7 = vsyncpa [#allocation4], 0  ;;  %s981_s0 = inlined_call_operand.hbm [shape: f32[24,8,128], index: 0, kind: input, shape index: {}]   ;;  %s982_s1 = inlined_call_operand.hbm [shape: bf16[128,128], index: 1, kind: input, shape index: {}]   ;;  %s983_s2 = inlined_call_operand.hbm [shape: f32[24,8,128], index: 2, kind: output, shape index: {}]  }
   0x1   :  { %9 = vsyncpa [#allocation4 + $0x1], 0 }
   0x2   :  { %10 = vsyncpa [#allocation7], 0 }
   0x3   :  { %11 = vsyncpa [#allocation5], 0 }
   0x4   :  { %13 = vsyncpa [#allocation5 + $0x1], 0  ;;  %s819_s9 = smov 0   ;;  %s821_s10 = smov 0  }
   0x5   :  { %s823_s11 = smov 0   ;;  %s825_s12 = smov 0  }
   0x6 LB: > { %s840_s13 = sadd.s32 4294967295, %s794_s12   ;;  %s511_s14 = sadd.s32 4294967294, %s794_s12   ;;  %s794_s12 = sphi %s825_s12, %s993_s12   ;;  %s790_s11 = sphi %s823_s11, %s992_s11   ;;  %s786_s10 = sphi %s821_s10, %s991_s10   ;;  %s782_s9 = sphi %s819_s9, %s990_s9  }
   0x7   : > { %p39_p0 = scmp.ne.s32.totalorder %s786_s10, %s782_s9  ;;  %p40_p1 = scmp.eq.s32.totalorder %s840_s13, 0 }
   0x8   : > { %p84_p2 = scmp.eq.s32.totalorder %s840_s13, 2  ;;  %p90_p3 = scmp.eq.s32.totalorder %s511_s14, 2 }
   0x9   : > { %p849_p4 = por %p40_p1, %p39_p0  ;;  %p512_p5 = scmp.ge.s32.totalorder %s794_s12, 1 }
   0xa   : > { %p854_p6 = por %p90_p3, %p39_p0  ;;  %p97_p7 = scmp.lt.s32.totalorder %s794_s12, 4 }
   0xb   : > { %s108_s19 = sshll.u32 %s982_s1, 4  ;;  %s796_s21 = smov [#allocation6]   ;;  %s109_s19 = int_to_ptr.hbm [resolvable:$true] %s108_s19 }
   0xc   : > { %p863_p9 = pnand %p512_p5, %p97_p7  ;;  %s110_s22 = sshll.u32 %s796_s21, 4  ;;  %s111_s22 = int_to_ptr.vmem [resolvable:$true] %s110_s22 }
   0xd   : > { %s872_s23 = sadd.s32 1, %s794_s12   ;;  %s797_s24 = smov 64  }
   0xe   : > { %p592_p10 = pneg %p863_p9  ;;  %s798_s25 = smov 4  }
   0xf   : > { %s23_s26 = ssub.s32 %s794_s12, %s872_s23  ;;  %s26_s27 = sadd.s32 1, %s790_s11 }
  0x10   : > { %p593_p11 = pnand %p592_p10, %p40_p1  ;;  %p24_p12 = scmp.eq.s32.totalorder %s23_s26, 0 }
  0x11   : > { %p33_p13 = scmp.ne.s32.totalorder %s790_s11, %s786_s10  ;;  %p34_p0 = scmp.eq.s32.totalorder %s794_s12, 0 }
  0x12   : > { %595 = dma.hbm_to_vmem [thread:$0]  (!%p593_p11), %s109_s19, 1024, %s111_s22, [#allocation7], %s797_s24, %s797_s24, %s798_s25  }
  0x13   : > { %p605_p3 = scmp.lt.s32.totalorder %s794_s12, 3  ;;  %p35_p5 = por %p34_p0, %p33_p13 }
  0x14   : > { %s882_s28 = scalar_select %p24_p12, %s790_s11, %s26_s27  }
  0x15   : > { %p886_p7 = por %p84_p2, %p33_p13  ;;  %s124_s30 = sand.u32 1, %s790_s11  }
  0x16   : > { %s574_s3 = sshll.u32 %s794_s12, 6  ;;  %s515_s4 = sshll.u32 %s124_s30, 6 }
  0x17   : > { %s133_s7 = scalar_lea.hbm %s981_s0, %s574_s3  ;;  %s128_s14 = scalar_lea.vmem [#allocation3], %s515_s4 }
  0x18   : > { %s134_s8 = sshll.u32 %s133_s7, 4  ;;  %s136_s17 = sshll.u32 %s128_s14, 4  ;;  %s135_s8 = int_to_ptr.hbm [resolvable:$true] %s134_s8  ;;  %s137_s17 = int_to_ptr.vmem [resolvable:$true] %s136_s17 }
  0x19   : > { %p897_p10 = pnand %p605_p3, %p35_p5  ;;  %s125_s19 = scalar_lea.sflag [#allocation4], %s124_s30 }
  0x1a   : > { %s694_s21 = sshra.s32 %s135_s8, 4  ;;  %s701_s26 = scalar_lea.hbm %s981_s0, 192  ;;  %s695_s21 = int_to_ptr.hbm [resolvable:$true] %s694_s21 }
  0x1b   : > { %s696_s22 = scalar_lea.hbm %s695_s21, 64  ;;  %p698_p11 = pneg %p897_p10 }
  0x1c   : > { %p697_p2 = scmp.ne.s32.totalorder %s695_s21, %s696_s22  ;;  %p702_p0 = scmp.lt.s32.totalorder %s695_s21, %s981_s0 }
  0x1d   : > { %p703_p3 = scmp.lt.s32.totalorder %s701_s26, %s696_s22 }
  0x1e   : > { %p699_p12 = pnand %p698_p11, %p697_p2 }
  0x1f   : > { %p704_p5 = por %p703_p3, %p702_p0 }
  0x20   : > { %p700_p13 = pneg %p699_p12 }
  0x22   : > { %p705_p8 = pnand %p704_p5, %p700_p13 }
  0x24   : > { %708 = shalt.err (!%p705_p8)
}
  0x25   : > { %s799_s30 = smov 128   ;;  %s800_s4 = smov 8  }
  0x26   : > { %599 = dma.hbm_to_vmem [thread:$0]  (!%p897_p10), %s135_s8, 1024, %s137_s17, %s125_s19, %s799_s30, %s799_s30, %s800_s4  }
  0x27   : > { %148 = sbr.rel (%p863_p9) target bundleno = 1211 (0x4bb), region = 28  ;;  %s914_s5 = sand.u32 (!%p863_p9), 1, %s786_s10  }
  0x28   : > { %s519_s6 = sshll.u32 (!%p863_p9), %s914_s5, 6  ;;  %s151_s7 = scalar_lea.sflag (!%p863_p9), [#allocation4], %s914_s5 }
  0x29   : > { %s918_s14 = scalar_lea.vmem (!%p863_p9), [#allocation3], %s519_s6 }
  0x2c   : > { %769 = dma.done.wait (%p849_p4), %s151_s7, 1024  }
  0x2d   : > { %771 = vsyncadd (%p849_p4), %s151_s7, 4294966272 }
  0x2e   : > { %773 = dma.done.wait (%p40_p1), [#allocation7], 1024  }
  0x2f   : > { %775 = vsyncadd (%p40_p1), [#allocation7], 4294966272  ;;  %s928_s20 = scalar_lea.vmem [#allocation8], %s519_s6  ;;  %p989_p8 = scmp.ne.s32.totalorder %s840_s13, 0 }
  0x31   : > { %186 = sbr.rel (%p989_p8) target bundleno = 56 (0x38), region = 40 }
  0x36   : > { %v801_v0 = vmov 0.0  }
  0x37   : > { %187 = vst [vmem:[#allocation2] sm:$0xff] %v801_v0 }
  0x38 PF: > { %v582_v1 = vld [vmem:[#allocation6 + $0x38] sm:$0xff]  ;;  %v581_v2 = vld [vmem:[#allocation6 + $0x30] sm:$0xff]  ;;  %v580_v3 = vld [vmem:[#allocation6 + $0x28] sm:$0xff]  ;;  %s583_s15 = sshll.u32 %s840_s13, 6  ;;  %s425_s19 = sshll.u32 %s928_s20, 4  ;;  %s426_s19 = int_to_ptr.vmem [resolvable:$true] %s425_s19 }
  0x39   : > { %255 = vmatpush.bf16.msra.mxu0 %v582_v1  ;;  %274 = vmatpush.bf16.msra.mxu1 %v582_v1  ;;  %v579_v4 = vld [vmem:[#allocation6 + $0x20] sm:$0xff]  ;;  %v578_v5 = vld [vmem:[#allocation6 + $0x18] sm:$0xff]  ;;  %v577_v6 = vld [vmem:[#allocation6 + $0x10] sm:$0xff]  ;;  %s424_s18 = scalar_lea.hbm %s983_s2, %s583_s15  ;;  %s413_s22 = scalar_lea.sflag [#allocation5], %s914_s5 }
  0x3a   : > { %294 = vmatpush.bf16.msra.mxu2 %v582_v1  ;;  %314 = vmatpush.bf16.msra.mxu3 %v582_v1  ;;  %v576_v7 = vld [vmem:[#allocation6 + $0x8] sm:$0xff]  ;;  %v575_v8 = vld [vmem:[#allocation6] sm:$0xff]  ;;  %v557_v23 = vld [vmem:[%s918_s14 + $0x10] sm:$0xff]  ;;  %s427_s21 = sshll.u32 %s424_s18, 4  ;;  %s744_s27 = scalar_lea.hbm %s983_s2, 192  ;;  %s428_s21 = int_to_ptr.hbm [resolvable:$true] %s427_s21 }
  0x3b   : > { %v205_v11 = vld [vmem:[%s918_s14] sm:$0xff]  ;;  %v555_v17 = vld [vmem:[%s918_s14 + $0x8] sm:$0xff]  ;;  %v559_v29 = vld [vmem:[%s918_s14 + $0x18] sm:$0xff]  ;;  %s738_s24 = sshra.s32 %s428_s21, 4  ;;  %s739_s24 = int_to_ptr.hbm [resolvable:$true] %s738_s24 }
  0x3c   : > { %v561_v35 = vld [vmem:[%s918_s14 + $0x20] sm:$0xff]  ;;  %v563_v41 = vld [vmem:[%s918_s14 + $0x28] sm:$0xff]  ;;  %v565_v47 = vld [vmem:[%s918_s14 + $0x30] sm:$0xff]  ;;  %s740_s13 = scalar_lea.hbm %s739_s24, 64  ;;  %p745_p10 = scmp.lt.s32.totalorder %s739_s24, %s983_s2 }
  0x3d   : > { %256 = vmatpush.bf16.msra.mxu0 %v581_v2  ;;  %275 = vmatpush.bf16.msra.mxu1 %v581_v2  ;;  %v567_v53 = vld [vmem:[%s918_s14 + $0x38] sm:$0xff]  ;;  %p741_p1 = scmp.ne.s32.totalorder %s739_s24, %s740_s13  ;;  %p746_p2 = scmp.lt.s32.totalorder %s744_s27, %s740_s13 }
  0x3e   : > { %295 = vmatpush.bf16.msra.mxu2 %v581_v2  ;;  %315 = vmatpush.bf16.msra.mxu3 %v581_v2  ;;  %v204_v9 = vld [vmem:[#allocation2] sm:$0xff] }
  0x3f   : > { %v206_v10 = vpack.c.bf16 %v204_v9, %v204_v9  ;;  %p742_p4 = pnand %p741_p1, %p886_p7  ;;  %p747_p11 = por %p746_p2, %p745_p10 }
  0x41   : > { %257 = vmatpush.bf16.msra.mxu0 %v580_v3  ;;  %276 = vmatpush.bf16.msra.mxu1 %v580_v3  ;;  %p743_p9 = pneg %p742_p4 }
  0x42   : > { %296 = vmatpush.bf16.msra.mxu2 %v580_v3  ;;  %316 = vmatpush.bf16.msra.mxu3 %v580_v3 }
  0x43   : > { %p748_p12 = pnand %p747_p11, %p743_p9 }
  0x45   : > { %258 = vmatpush.bf16.msra.mxu0 %v579_v4  ;;  %277 = vmatpush.bf16.msra.mxu1 %v579_v4 }
  0x46   : > { %297 = vmatpush.bf16.msra.mxu2 %v579_v4  ;;  %317 = vmatpush.bf16.msra.mxu3 %v579_v4 }
  0x49   : > { %259 = vmatpush.bf16.msra.mxu0 %v578_v5  ;;  %278 = vmatpush.bf16.msra.mxu1 %v578_v5 }
  0x4a   : > { %298 = vmatpush.bf16.msra.mxu2 %v578_v5  ;;  %318 = vmatpush.bf16.msra.mxu3 %v578_v5 }
  0x4d   : > { %260 = vmatpush.bf16.msra.mxu0 %v577_v6  ;;  %279 = vmatpush.bf16.msra.mxu1 %v577_v6 }
  0x4e   : > { %299 = vmatpush.bf16.msra.mxu2 %v577_v6  ;;  %319 = vmatpush.bf16.msra.mxu3 %v577_v6 }
  0x51   : > { %261 = vmatpush.bf16.msra.mxu0 %v576_v7  ;;  %280 = vmatpush.bf16.msra.mxu1 %v576_v7 }
  0x52   : > { %300 = vmatpush.bf16.msra.mxu2 %v576_v7  ;;  %320 = vmatpush.bf16.msra.mxu3 %v576_v7 }
  0x55   : > { %262 = vmatpush.bf16.msra.mxu0 %v575_v8  ;;  %281 = vmatpush.bf16.msra.mxu1 %v575_v8 }
  0x56   : > { %301 = vmatpush.bf16.msra.mxu2 %v575_v8  ;;  %321 = vmatpush.bf16.msra.mxu3 %v575_v8 }
  0x58   : > { %263 = vmatmul.bf16.vlgmr.msra.gmra.mxu0 %v206_v10 }
  0x59   : > { %334 = vmatpush.bf16.msrb.mxu0 %v582_v1  ;;  %354 = vmatpush.bf16.msrb.mxu1 %v582_v1 }
  0x5a   : > { %374 = vmatpush.bf16.msrb.mxu2 %v582_v1  ;;  %394 = vmatpush.bf16.msrb.mxu3 %v582_v1 }
  0x5d   : > { %335 = vmatpush.bf16.msrb.mxu0 %v581_v2  ;;  %355 = vmatpush.bf16.msrb.mxu1 %v581_v2 }
  0x5e   : > { %375 = vmatpush.bf16.msrb.mxu2 %v581_v2  ;;  %395 = vmatpush.bf16.msrb.mxu3 %v581_v2 }
  0x61   : > { %336 = vmatpush.bf16.msrb.mxu0 %v580_v3  ;;  %356 = vmatpush.bf16.msrb.mxu1 %v580_v3 }
  0x62   : > { %376 = vmatpush.bf16.msrb.mxu2 %v580_v3  ;;  %396 = vmatpush.bf16.msrb.mxu3 %v580_v3 }
  0x65   : > { %337 = vmatpush.bf16.msrb.mxu0 %v579_v4  ;;  %357 = vmatpush.bf16.msrb.mxu1 %v579_v4 }
  0x66   : > { %377 = vmatpush.bf16.msrb.mxu2 %v579_v4  ;;  %397 = vmatpush.bf16.msrb.mxu3 %v579_v4 }
  0x69   : > { %338 = vmatpush.bf16.msrb.mxu0 %v578_v5  ;;  %358 = vmatpush.bf16.msrb.mxu1 %v578_v5 }
  0x6a   : > { %378 = vmatpush.bf16.msrb.mxu2 %v578_v5  ;;  %398 = vmatpush.bf16.msrb.mxu3 %v578_v5 }
  0x6d   : > { %339 = vmatpush.bf16.msrb.mxu0 %v577_v6  ;;  %359 = vmatpush.bf16.msrb.mxu1 %v577_v6 }
  0x6e   : > { %379 = vmatpush.bf16.msrb.mxu2 %v577_v6  ;;  %399 = vmatpush.bf16.msrb.mxu3 %v577_v6 }
  0x71   : > { %340 = vmatpush.bf16.msrb.mxu0 %v576_v7  ;;  %360 = vmatpush.bf16.msrb.mxu1 %v576_v7 }
  0x72   : > { %380 = vmatpush.bf16.msrb.mxu2 %v576_v7  ;;  %400 = vmatpush.bf16.msrb.mxu3 %v576_v7 }
  0x75   : > { %341 = vmatpush.bf16.msrb.mxu0 %v575_v8  ;;  %361 = vmatpush.bf16.msrb.mxu1 %v575_v8 }
  0x76   : > { %381 = vmatpush.bf16.msrb.mxu2 %v575_v8  ;;  %401 = vmatpush.bf16.msrb.mxu3 %v575_v8 }
  0xd5   : > { %v264_v12 = vpop.f32.mrf.mxu0 }
  0xd6   : > { %v268_v13 = vadd.f32 %v264_v12, %v205_v11 }
  0xd8   : > { %648 = vtanh.f32 %v268_v13 }
  0xdd   : > { %v266_v14 = vpop.f32.mrf.mxu0 }
  0xde   : > { %v649_v15 = vpop.eup %648 }
  0xdf   : > { %270 = vst [vmem:[%s928_s20] sm:$0xff] %v649_v15  ;;  %v273_v16 = vpack.c.bf16 %v649_v15, %v649_v15 }
  0xe1   : > { %282 = vmatmul.bf16.vlgmr.msra.gmra.mxu1 %v273_v16 }
 0x15e   : > { %v283_v18 = vpop.f32.mrf.mxu1 }
 0x15f   : > { %v287_v19 = vadd.f32 %v555_v17, %v283_v18 }
 0x161   : > { %650 = vtanh.f32 %v287_v19 }
 0x166   : > { %v285_v20 = vpop.f32.mrf.mxu1 }
 0x167   : > { %v651_v21 = vpop.eup %650 }
 0x168   : > { %556 = vst [vmem:[%s928_s20 + $0x8] sm:$0xff] %v651_v21  ;;  %v293_v22 = vpack.c.bf16 %v651_v21, %v651_v21 }
 0x16a   : > { %302 = vmatmul.bf16.vlgmr.msra.gmra.mxu2 %v293_v22 }
 0x1ed   : > { %v303_v24 = vpop.f32.mrf.mxu2 }
 0x1ee   : > { %v307_v25 = vadd.f32 %v557_v23, %v303_v24 }
 0x1f0   : > { %652 = vtanh.f32 %v307_v25 }
 0x1f5   : > { %v305_v26 = vpop.f32.mrf.mxu2 }
 0x1f6   : > { %v653_v27 = vpop.eup %652 }
 0x1f7   : > { %558 = vst [vmem:[%s928_s20 + $0x10] sm:$0xff] %v653_v27  ;;  %v313_v28 = vpack.c.bf16 %v653_v27, %v653_v27 }
 0x1f9   : > { %322 = vmatmul.bf16.vlgmr.msra.gmra.mxu3 %v313_v28 }
 0x27c   : > { %v323_v30 = vpop.f32.mrf.mxu3 }
 0x27d   : > { %v327_v31 = vadd.f32 %v559_v29, %v323_v30 }
 0x27f   : > { %654 = vtanh.f32 %v327_v31 }
 0x284   : > { %v325_v32 = vpop.f32.mrf.mxu3 }
 0x285   : > { %v655_v33 = vpop.eup %654 }
 0x286   : > { %560 = vst [vmem:[%s928_s20 + $0x18] sm:$0xff] %v655_v33  ;;  %v333_v34 = vpack.c.bf16 %v655_v33, %v655_v33 }
 0x288   : > { %342 = vmatmul.bf16.vlgmr.msrb.gmra.mxu0 %v333_v34 }
 0x305   : > { %v343_v36 = vpop.f32.mrf.mxu0 }
 0x306   : > { %v347_v37 = vadd.f32 %v561_v35, %v343_v36 }
 0x308   : > { %656 = vtanh.f32 %v347_v37 }
 0x30d   : > { %v345_v38 = vpop.f32.mrf.mxu0 }
 0x30e   : > { %v657_v39 = vpop.eup %656 }
 0x30f   : > { %562 = vst [vmem:[%s928_s20 + $0x20] sm:$0xff] %v657_v39  ;;  %v353_v40 = vpack.c.bf16 %v657_v39, %v657_v39 }
 0x311   : > { %362 = vmatmul.bf16.vlgmr.msrb.gmra.mxu1 %v353_v40 }
 0x38e   : > { %v363_v42 = vpop.f32.mrf.mxu1 }
 0x38f   : > { %v367_v43 = vadd.f32 %v563_v41, %v363_v42 }
 0x391   : > { %658 = vtanh.f32 %v367_v43 }
 0x396   : > { %v365_v44 = vpop.f32.mrf.mxu1 }
 0x397   : > { %v659_v45 = vpop.eup %658 }
 0x398   : > { %564 = vst [vmem:[%s928_s20 + $0x28] sm:$0xff] %v659_v45  ;;  %v373_v46 = vpack.c.bf16 %v659_v45, %v659_v45 }
 0x39a   : > { %382 = vmatmul.bf16.vlgmr.msrb.gmra.mxu2 %v373_v46 }
 0x41d   : > { %v383_v48 = vpop.f32.mrf.mxu2 }
 0x41e   : > { %v387_v49 = vadd.f32 %v565_v47, %v383_v48 }
 0x420   : > { %660 = vtanh.f32 %v387_v49 }
 0x425   : > { %v385_v50 = vpop.f32.mrf.mxu2 }
 0x426   : > { %v661_v51 = vpop.eup %660 }
 0x427   : > { %566 = vst [vmem:[%s928_s20 + $0x30] sm:$0xff] %v661_v51  ;;  %v393_v52 = vpack.c.bf16 %v661_v51, %v661_v51 }
 0x429   : > { %402 = vmatmul.bf16.vlgmr.msrb.gmra.mxu3 %v393_v52 }
 0x4ac   : > { %v403_v54 = vpop.f32.mrf.mxu3 }
 0x4ad   : > { %v407_v55 = vadd.f32 %v567_v53, %v403_v54 }
 0x4af   : > { %662 = vtanh.f32 %v407_v55 }
 0x4b4   : > { %v405_v56 = vpop.f32.mrf.mxu3 }
 0x4b5   : > { %v663_v57 = vpop.eup %662 }
 0x4b6   : > { %568 = vst [vmem:[%s928_s20 + $0x38] sm:$0xff] %v663_v57 }
 0x4b7   : > { %411 = vst [vmem:[#allocation2] sm:$0xff] %v663_v57 }
 0x4b8   : > { %751 = shalt.err (!%p748_p12)
}
 0x4b9   : > { %s802_s4 = smov 128   ;;  %s803_s5 = smov 8  }
 0x4ba   : > { %590 = dma.vmem_to_hbm [thread:$0]  (%p886_p7), %s426_s19, 1024, %s428_s21, %s413_s22, %s802_s4, %s802_s4, %s803_s5  }
 0x4bb PF: > { %p607_p13 = scmp.ge.s32.totalorder %s794_s12, 2  ;;  %s442_s6 = sand.u32 1, %s782_s9  }
 0x4bc   : > { %s443_s7 = scalar_lea.sflag [#allocation5], %s442_s6 }
 0x4bd   : > { %p601_p0 = pnand %p607_p13, %p854_p6 }
 0x4bf   : > { %p602_p3 = pneg %p601_p0 }
 0x4c1   : > { %777 = dma.done.wait (%p602_p3), %s443_s7, 1024  }
 0x4c2   : > { %779 = vsyncadd (%p602_p3), %s443_s7, 4294966272  ;;  %p16_p5 = scmp.ge.s32.totalorder %s872_s23, 5   ;;  %s990_s9 = smov %s786_s10 }
 0x4c3   : > { %s991_s10 = smov %s790_s11  ;;  %s992_s11 = smov %s882_s28 }
 0x4c4   : > { %s993_s12 = smov %s872_s23  ;;  %18 = sbr.rel (!%p16_p5) target bundleno = 6 (0x6), region = 95 }
 0x4c9   :  { %449 = vsyncpa [#allocation4], 1 }
 0x4ca   :  { %451 = vsyncpa [#allocation4 + $0x1], 1 }
 0x4cb   :  { %452 = vsyncpa [#allocation7], 1 }
 0x4cc   :  { %453 = vsyncpa [#allocation5], 1 }
 0x4cd   :  { %455 = vsyncpa [#allocation5 + $0x1], 1 }

</bundles_post_ra>
